<compile_context>
chip_gen: v7x
topology: tpu7x:2x2x1
jax: 0.10.0
libtpu: 0.0.40
codegen_flags: <defaults>
</compile_context>

<pallas_src>
import jax
import jax.numpy as jnp
from jax.experimental import pallas as pl
from jax.experimental.pallas import tpu as pltpu

EPS = 1e-5
NEG_SLOPE = 0.2
# bf16 operands for the MXU and bf16 activation storage in HBM; accumulation and
# all BN / LeakyReLU math stay in f32.
MXU_DTYPE = jnp.bfloat16
ACT_DTYPE = jnp.bfloat16


def _lrelu(v):
    return jnp.where(v >= 0, v, NEG_SLOPE * v)


def _vmem_limit(block_bytes):
    """Explicit scoped-VMEM limit: double-buffered blocks + headroom, clamped to
    [32 MiB, 64 MiB] (64 MiB = v7x physical per-TC VMEM)."""
    need = int(2 * block_bytes * 1.5) + (2 << 20)
    return min(max(need, 32 << 20), 64 << 20)


# --------------------------------------------------------------------------
# Pass 0: per-channel batch sums (BN training mode) -- accumulator kernel.
# --------------------------------------------------------------------------
def _channel_sums_kernel(x_ref, sum_ref, sq_ref):
    v = x_ref[0].astype(jnp.float32)                              # (A, B, C)
    s = jnp.sum(jnp.sum(v, axis=0), axis=0, keepdims=True)        # (1, C)
    q = jnp.sum(jnp.sum(v * v, axis=0), axis=0, keepdims=True)    # (1, C)

    @pl.when(pl.program_id(0) == 0)
    def _():
        sum_ref[...] = jnp.zeros_like(sum_ref)
        sq_ref[...] = jnp.zeros_like(sq_ref)

    sum_ref[...] += s
    sq_ref[...] += q


def _channel_sums(x):
    """Per-channel (sum, sum_sq) of an (N, A, B, C) tensor; f32 accumulation."""
    N, A, B, C = x.shape
    blk_bytes = A * B * C * x.dtype.itemsize + 2 * C * 4
    return pl.pallas_call(
        _channel_sums_kernel,
        out_shape=(jax.ShapeDtypeStruct((1, C), jnp.float32),
                   jax.ShapeDtypeStruct((1, C), jnp.float32)),
        grid=(N,),
        in_specs=[pl.BlockSpec((1, A, B, C), lambda n: (n, 0, 0, 0))],
        out_specs=(pl.BlockSpec((1, C), lambda n: (0, 0)),
                   pl.BlockSpec((1, C), lambda n: (0, 0))),
        compiler_params=pltpu.CompilerParams(
            dimension_semantics=("arbitrary",),   # accumulator init needs this
            vmem_limit_bytes=_vmem_limit(blk_bytes)),
    )(x)


# --------------------------------------------------------------------------
# Stage 1: BN1 + LeakyReLU + [conv3x3 fused with avg_pool2d(2)]
#          + pooled 1x1 shortcut + per-image BN2 partial stats   (per image).
# --------------------------------------------------------------------------
def _stage1_kernel(xr_ref, bs_ref, bb_ref, w_ref, b_ref, wsc_ref, bsc_ref,
                   rp_ref, scut_ref, sum_ref, sq_ref, act4):
    # xr_ref  : (1, H2, 2, W2, 2*Cin) bf16 input, rows/cols even-odd interleaved
    # w_ref   : (4, 3, 2*Cin, Cm)     bf16 conv1(3x3)+pool folded weights
    # wsc_ref : (2*Cin, Cout)         bf16 1x1 shortcut conv with pool folded in
    # rp_ref  : (1, H2, W2, Cm)       bf16 pooled conv1 output
    # scut_ref: (1, H2, W2, Cout)     bf16 pooled shortcut
    # sum/sq  : (1, 1, Cm)            f32 per-image BN2 partial statistics
    # act4    : (H2+2, 2, W2+2, 2*Cin) bf16 zero-haloed lrelu(BN1(x)), interleaved
    _, H2, _, W2, C2 = xr_ref.shape
    Cm = rp_ref.shape[-1]
    Cout = scut_ref.shape[-1]

    # BN1 (precomputed scale/shift, f32 math) + LeakyReLU, one bf16 cast.
    xv = xr_ref[0].astype(jnp.float32)                            # (H2, 2, W2, C2)
    act = _lrelu(xv * bs_ref[...] + bb_ref[...]).astype(ACT_DTYPE)

    # Zero only the 1-block halo; the interior is fully overwritten by ONE store.
    act4[0] = jnp.zeros((2, W2 + 2, C2), ACT_DTYPE)
    act4[H2 + 1] = jnp.zeros((2, W2 + 2, C2), ACT_DTYPE)
    act4[pl.ds(1, H2), :, 0, :] = jnp.zeros((H2, 2, C2), ACT_DTYPE)
    act4[pl.ds(1, H2), :, W2 + 1, :] = jnp.zeros((H2, 2, C2), ACT_DTYPE)
    act4[pl.ds(1, H2), :, pl.ds(1, W2), :] = act

    # conv3x3 + 2x2 avg-pool == 4x4/stride-2 conv; with the interleaved layout and
    # pre-folded weights each (row-tap ty, col-block j0) is ONE big bf16 matmul.
    acc = jnp.zeros((H2 * W2, Cm), jnp.float32)
    for ty in range(4):
        ry = ty - 1
        a = ry & 1                      # row parity inside the interleaved block
        i0 = (ry - a) // 2 + 1          # row-block start (0, 1 or 2)
        for j0 in range(3):
            lhs = act4[pl.ds(i0, H2), a, pl.ds(j0, W2), :].reshape(H2 * W2, C2)
            acc = acc + jnp.dot(lhs, w_ref[ty, j0],
                                preferred_element_type=jnp.float32)
    rpv = acc + b_ref[...]                                        # f32 (H2*W2, Cm)
    rp_ref[0] = rpv.astype(rp_ref.dtype).reshape(H2, W2, Cm)      # one block store

    # per-image BN2 partial statistics (finished in f32 in the wrapper).
    sum_ref[0] = jnp.sum(rpv, axis=0, keepdims=True)
    sq_ref[0] = jnp.sum(rpv * rpv, axis=0, keepdims=True)

    # shortcut: avg_pool2d(conv1x1(x), 2).  Row-parity sum on the VPU; the column
    # parity sum and the 0.25 pooling factor are folded into wsc.
    xs = (xv[:, 0] + xv[:, 1]).reshape(H2 * W2, C2).astype(MXU_DTYPE)
    scv = jnp.dot(xs, wsc_ref[...],
                  preferred_element_type=jnp.float32) + bsc_ref[...]
    scut_ref[0] = scv.astype(scut_ref.dtype).reshape(H2, W2, Cout)


# --------------------------------------------------------------------------
# Stage 2: BN2 + LeakyReLU + conv3x3, plus the precomputed shortcut (per image).
# --------------------------------------------------------------------------
def _stage2_kernel(rp_ref, scut_ref, bs_ref, bb_ref, w2_ref, b2_ref, o_ref, pad2):
    # rp_ref  : (1, H2, W2, Cm)   bf16 pooled conv1 output
    # scut_ref: (1, H2, W2, Cout) bf16 precomputed pooled shortcut
    # w2_ref  : (9, Cm, Cout)     bf16 conv2 3x3 taps
    # pad2    : (H2+2, W2+2, Cm)  bf16 zero-haloed lrelu(BN2(rp))
    _, H2, W2, Cm = rp_ref.shape
    Cout = o_ref.shape[-1]

    # BN2 + LeakyReLU (f32 math), halo-only zero init, one interior store.
    a2 = _lrelu(rp_ref[0].astype(jnp.float32) * bs_ref[...]
                + bb_ref[...]).astype(ACT_DTYPE)
    pad2[0] = jnp.zeros((W2 + 2, Cm), ACT_DTYPE)
    pad2[H2 + 1] = jnp.zeros((W2 + 2, Cm), ACT_DTYPE)
    pad2[pl.ds(1, H2), 0, :] = jnp.zeros((H2, Cm), ACT_DTYPE)
    pad2[pl.ds(1, H2), W2 + 1, :] = jnp.zeros((H2, Cm), ACT_DTYPE)
    pad2[pl.ds(1, H2), pl.ds(1, W2), :] = a2

    # 3x3 conv: 9 whole-image bf16 matmuls (M = H2*W2), f32 accumulation.
    acc = jnp.zeros((H2 * W2, Cout), jnp.float32)
    for dy in range(3):
        for dx in range(3):
            lhs = pad2[pl.ds(dy, H2), pl.ds(dx, W2), :].reshape(H2 * W2, Cm)
            acc = acc + jnp.dot(lhs, w2_ref[dy * 3 + dx],
                                preferred_element_type=jnp.float32)
    res = (acc + b2_ref[...]).reshape(H2, W2, Cout)

    o_ref[0] = (res + scut_ref[0].astype(jnp.float32)).astype(o_ref.dtype)


# --------------------------------------------------------------------------
# Weight folding: (3x3 conv, SAME) followed by 2x2 avg-pool -> 4x4/stride-2 conv,
# arranged for the even/odd interleaved activation layout.
# --------------------------------------------------------------------------
def _fold_conv_pool_weights(w_hwio):
    Cin, Co = w_hwio.shape[2], w_hwio.shape[3]
    k4 = [[None] * 4 for _ in range(4)]
    for ty in range(4):
        for tx in range(4):
            acc = jnp.zeros((Cin, Co), jnp.float32)
            for dy in (ty - 1, ty):
                if 0 <= dy <= 2:
                    for dx in (tx - 1, tx):
                        if 0 <= dx <= 2:
                            acc = acc + w_hwio[dy, dx]
            k4[ty][tx] = 0.25 * acc
    zero = jnp.zeros((Cin, Co), jnp.float32)
    rows = []
    for ty in range(4):
        blocks = [
            jnp.concatenate([zero, k4[ty][0]], axis=0),       # j0=0: tx=0 (odd cols)
            jnp.concatenate([k4[ty][1], k4[ty][2]], axis=0),  # j0=1: tx=1,2
            jnp.concatenate([k4[ty][3], zero], axis=0),       # j0=2: tx=3 (even cols)
        ]
        rows.append(jnp.stack(blocks, axis=0))                # (3, 2*Cin, Co)
    return jnp.stack(rows, axis=0)                            # (4, 3, 2*Cin, Co)


# --------------------------------------------------------------------------
# Public wrapper: layout glue + the three pallas_calls.
# --------------------------------------------------------------------------
def res_blk_forward(x_nchw, p):
    N, Cin, H, W = x_nchw.shape
    assert H % 2 == 0 and W % 2 == 0
    H2, W2 = H // 2, W // 2
    Cout = p["w2"].shape[0]
    C2 = 2 * Cin

    # interleaved bf16 layout: xr[n, i, a, j, b*Cin + c] = x[n, c, 2i+a, 2j+b]
    x = jnp.transpose(x_nchw, (0, 2, 3, 1))                              # NHWC
    xr = x.reshape(N, H2, 2, W2, 2, Cin).reshape(N, H2, 2, W2, C2).astype(ACT_DTYPE)

    # ---- BN1 statistics: one Pallas reduction straight off the bf16 layout ----
    sx, qx = _channel_sums(xr.reshape(N, 2 * H2, W2, C2))
    s1 = sx[:, :Cin] + sx[:, Cin:]                   # fold the two column parities
    q1 = qx[:, :Cin] + qx[:, Cin:]
    cnt1 = float(N * H * W)
    mean1 = s1 / cnt1
    var1 = jnp.maximum(q1 / cnt1 - mean1 * mean1, 0.0)   # biased var (BN training)
    scale1 = p["g1"].reshape(1, Cin) * jax.lax.rsqrt(var1 + EPS)
    shift1 = p["be1"].reshape(1, Cin) - mean1 * scale1
    scale1_2 = jnp.concatenate([scale1, scale1], axis=-1)                # (1, 2Cin)
    shift1_2 = jnp.concatenate([shift1, shift1], axis=-1)

    # conv1 weights folded with the pool; shortcut 1x1 conv with pool folded in.
    w1_hwio = jnp.transpose(p["w1"], (2, 3, 1, 0))                       # (3,3,Cin,Cin)
    wfold1 = _fold_conv_pool_weights(w1_hwio).astype(MXU_DTYPE)          # (4,3,2Cin,Cin)
    b1 = p["b1"].reshape(1, Cin)
    wsc = jnp.transpose(p["wsc"][:, :, 0, 0])                            # (Cin, Cout)
    wsc2 = (0.25 * jnp.concatenate([wsc, wsc], axis=0)).astype(MXU_DTYPE)
    bsc = p["bsc"].reshape(1, Cout)

    s1_bytes = (H2 * 2 * W2 * C2 * 2 + 4 * 3 * C2 * Cin * 2 + C2 * Cout * 2
                + H2 * W2 * Cin * 2 + H2 * W2 * Cout * 2
                + (H2 + 2) * 2 * (W2 + 2) * C2 * 2 + (1 << 14))

    rp, scut, sum2, sq2 = pl.pallas_call(
        _stage1_kernel,
        out_shape=(jax.ShapeDtypeStruct((N, H2, W2, Cin), ACT_DTYPE),
                   jax.ShapeDtypeStruct((N, H2, W2, Cout), ACT_DTYPE),
                   jax.ShapeDtypeStruct((N, 1, Cin), jnp.float32),
                   jax.ShapeDtypeStruct((N, 1, Cin), jnp.float32)),
        grid=(N,),
        in_specs=[
            pl.BlockSpec((1, H2, 2, W2, C2), lambda n: (n, 0, 0, 0, 0)),
            pl.BlockSpec((1, C2), lambda n: (0, 0)),
            pl.BlockSpec((1, C2), lambda n: (0, 0)),
            pl.BlockSpec((4, 3, C2, Cin), lambda n: (0, 0, 0, 0)),
            pl.BlockSpec((1, Cin), lambda n: (0, 0)),
            pl.BlockSpec((C2, Cout), lambda n: (0, 0)),
            pl.BlockSpec((1, Cout), lambda n: (0, 0)),
        ],
        out_specs=(pl.BlockSpec((1, H2, W2, Cin), lambda n: (n, 0, 0, 0)),
                   pl.BlockSpec((1, H2, W2, Cout), lambda n: (n, 0, 0, 0)),
                   pl.BlockSpec((1, 1, Cin), lambda n: (n, 0, 0)),
                   pl.BlockSpec((1, 1, Cin), lambda n: (n, 0, 0))),
        scratch_shapes=[pltpu.VMEM((H2 + 2, 2, W2 + 2, C2), ACT_DTYPE)],
        compiler_params=pltpu.CompilerParams(
            dimension_semantics=("parallel",),
            vmem_limit_bytes=_vmem_limit(s1_bytes)),
    )(xr, scale1_2, shift1_2, wfold1, b1, wsc2, bsc)

    # ---- BN2 statistics: finished in f32 from the per-image stage-1 partials ---
    cnt2 = float(N * H2 * W2)
    mean2 = jnp.sum(sum2, axis=0) / cnt2                                 # (1, Cin)
    var2 = jnp.maximum(jnp.sum(sq2, axis=0) / cnt2 - mean2 * mean2, 0.0)
    scale2 = p["g2"].reshape(1, Cin) * jax.lax.rsqrt(var2 + EPS)
    shift2 = p["be2"].reshape(1, Cin) - mean2 * scale2

    w2_taps = jnp.transpose(p["w2"], (2, 3, 1, 0)).reshape(9, Cin, Cout)
    w2_taps = w2_taps.astype(MXU_DTYPE)
    b2 = p["b2"].reshape(1, Cout)

    s2_bytes = (H2 * W2 * Cin * 2 + H2 * W2 * Cout * 2 + 9 * Cin * Cout * 2
                + H2 * W2 * Cout * 4 + (H2 + 2) * (W2 + 2) * Cin * 2 + (1 << 14))

    out = pl.pallas_call(
        _stage2_kernel,
        out_shape=jax.ShapeDtypeStruct((N, H2, W2, Cout), jnp.float32),
        grid=(N,),
        in_specs=[
            pl.BlockSpec((1, H2, W2, Cin), lambda n: (n, 0, 0, 0)),
            pl.BlockSpec((1, H2, W2, Cout), lambda n: (n, 0, 0, 0)),
            pl.BlockSpec((1, Cin), lambda n: (0, 0)),
            pl.BlockSpec((1, Cin), lambda n: (0, 0)),
            pl.BlockSpec((9, Cin, Cout), lambda n: (0, 0, 0)),
            pl.BlockSpec((1, Cout), lambda n: (0, 0)),
        ],
        out_specs=pl.BlockSpec((1, H2, W2, Cout), lambda n: (n, 0, 0, 0)),
        scratch_shapes=[pltpu.VMEM((H2 + 2, W2 + 2, Cin), ACT_DTYPE)],
        compiler_params=pltpu.CompilerParams(
            dimension_semantics=("parallel",),
            vmem_limit_bytes=_vmem_limit(s2_bytes)),
    )(rp, scut, scale2, shift2, w2_taps, b2)

    return jnp.transpose(out, (0, 3, 1, 2))                              # NCHW


# --------------------------------------------------------------------------
# Parameter setup (deterministic, synthetic) incl. spectral-norm reparam (glue).
# --------------------------------------------------------------------------
def _spectral_normalize(w, key):
    # one power-iteration step, as in torch.nn.utils.spectral_norm (training fwd)
    o = w.shape[0]
    wm = w.reshape(o, -1)
    u = jax.random.normal(key, (o,), jnp.float32)
    u = u / (jnp.linalg.norm(u) + 1e-12)
    v = wm.T @ u
    v = v / (jnp.linalg.norm(v) + 1e-12)
    u = wm @ v
    u = u / (jnp.linalg.norm(u) + 1e-12)
    sigma = u @ wm @ v
    return w / sigma


def init_params(key, cin, cout):
    ks = jax.random.split(key, 9)
    w_sc = 0.3 * jax.random.normal(ks[0], (cout, cin, 1, 1), jnp.float32)
    b_sc = 0.1 * jax.random.normal(ks[1], (cout,), jnp.float32)
    w_r1 = 0.3 * jax.random.normal(ks[2], (cin, cin, 3, 3), jnp.float32)
    b_r1 = 0.1 * jax.random.normal(ks[3], (cin,), jnp.float32)
    w_r2 = 0.3 * jax.random.normal(ks[4], (cout, cin, 3, 3), jnp.float32)
    b_r2 = 0.1 * jax.random.normal(ks[5], (cout,), jnp.float32)
    return dict(
        wsc=_spectral_normalize(w_sc, ks[6]), bsc=b_sc,
        w1=_spectral_normalize(w_r1, ks[7]), b1=b_r1,
        w2=_spectral_normalize(w_r2, ks[8]), b2=b_r2,
        g1=jnp.ones((cin,), jnp.float32), be1=jnp.zeros((cin,), jnp.float32),
        g2=jnp.ones((cin,), jnp.float32), be2=jnp.zeros((cin,), jnp.float32),
    )


# --------------------------------------------------------------------------
# Pure-JAX reference (correctness check).
# --------------------------------------------------------------------------
def res_blk_reference(x_nchw, p):
    x = jnp.transpose(x_nchw, (0, 2, 3, 1)).astype(jnp.float32)

    def bn(a, g, b):
        mean = jnp.mean(a, axis=(0, 1, 2), keepdims=True)
        var = jnp.mean(a * a, axis=(0, 1, 2), keepdims=True) - mean * mean
        return (a - mean) * jax.lax.rsqrt(var + EPS) * g.reshape(1, 1, 1, -1) \
            + b.reshape(1, 1, 1, -1)

    def conv3x3(a, w_oihw, b):
        w = jnp.transpose(w_oihw, (2, 3, 1, 0))
        y = jax.lax.conv_general_dilated(
            a, w, (1, 1), "SAME", dimension_numbers=("NHWC", "HWIO", "NHWC"))
        return y + b.reshape(1, 1, 1, -1)

    def pool(a):
        n, h, w, c = a.shape
        return a.reshape(n, h // 2, 2, w // 2, 2, c).mean(axis=(2, 4))

    wsc = jnp.transpose(p["wsc"][:, :, 0, 0])
    shortcut = pool(jnp.einsum("nhwc,cd->nhwd", x, wsc)
                    + p["bsc"].reshape(1, 1, 1, -1))
    r = conv3x3(_lrelu(bn(x, p["g1"], p["be1"])), p["w1"], p["b1"])
    r = pool(r)
    r = conv3x3(_lrelu(bn(r, p["g2"], p["be2"])), p["w2"], p["b2"])
    return jnp.transpose(shortcut + r, (0, 3, 1, 2))


if __name__ == "__main__":
    key = jax.random.PRNGKey(0)
    N, Cin, Cout, H, W = 2, 4, 8, 16, 16
    kx, kp = jax.random.split(key)

    x = jax.random.normal(kx, (N, Cin, H, W), jnp.float32)
    params = init_params(kp, Cin, Cout)

    out = jax.block_until_ready(res_blk_forward(x, params))
    assert out.shape == (N, Cout, H // 2, W // 2)

    ref = res_blk_reference(x, params)
    err = float(jnp.max(jnp.abs(out - ref)))
    tol = 1e-3 if ACT_DTYPE == jnp.float32 else 1e-1   # bf16 activations/weights
    assert err < tol, f"kernel/reference mismatch, max abs err = {err}"

    print("KERNEL_OK")
</pallas_src>

<mosaic_0001>
module attributes {stable_mosaic.version = 11 : i64} {
  func.func @_channel_sums_kernel(%arg0: i32, %arg1: memref<1x16x8x8xbf16, #tpu.memory_space<vmem>>, %arg2: memref<1x8xf32, #tpu.memory_space<vmem>>, %arg3: memref<1x8xf32, #tpu.memory_space<vmem>>) attributes {dimension_semantics = [#tpu.dimension_semantics<arbitrary>], iteration_bounds = array<i64: 2>, scalar_prefetch = 0 : i64, scratch_operands = 0 : i64, tpu.core_type = #tpu.core_type<tc>, window_params = [{transform_indices = @transform_0, window_bounds = array<i64: 1, 16, 8, 8>}, {pipeline_mode = #tpu.pipeline_mode<synchronous>, transform_indices = @transform_1, window_bounds = array<i64: 1, 8>}, {pipeline_mode = #tpu.pipeline_mode<synchronous>, transform_indices = @transform_2, window_bounds = array<i64: 1, 8>}]} {
    %c0 = arith.constant 0 : index
    %c0_0 = arith.constant 0 : index
    %c0_1 = arith.constant 0 : index
    %c0_2 = arith.constant 0 : index
    %0 = vector.load %arg1[%c0, %c0_0, %c0_1, %c0_2] : memref<1x16x8x8xbf16, #tpu.memory_space<vmem>>, vector<1x16x8x8xbf16>
    %1 = vector.shape_cast %0 : vector<1x16x8x8xbf16> to vector<16x8x8xbf16>
    %2 = arith.extf %1 : vector<16x8x8xbf16> to vector<16x8x8xf32>
    %cst = arith.constant dense<0.000000e+00> : vector<8x8xf32>
    %3 = vector.multi_reduction <add>, %2, %cst [0] : vector<16x8x8xf32> to vector<8x8xf32>
    %cst_3 = arith.constant dense<0.000000e+00> : vector<8xf32>
    %4 = vector.multi_reduction <add>, %3, %cst_3 [0] : vector<8x8xf32> to vector<8xf32>
    %5 = vector.shape_cast %4 : vector<8xf32> to vector<1x8xf32>
    %6 = arith.mulf %2, %2 : vector<16x8x8xf32>
    %cst_4 = arith.constant dense<0.000000e+00> : vector<8x8xf32>
    %7 = vector.multi_reduction <add>, %6, %cst_4 [0] : vector<16x8x8xf32> to vector<8x8xf32>
    %cst_5 = arith.constant dense<0.000000e+00> : vector<8xf32>
    %8 = vector.multi_reduction <add>, %7, %cst_5 [0] : vector<8x8xf32> to vector<8xf32>
    %9 = vector.shape_cast %8 : vector<8xf32> to vector<1x8xf32>
    %c0_i32 = arith.constant 0 : i32
    %10 = arith.cmpi eq, %arg0, %c0_i32 : i32
    %11 = arith.extui %10 : i1 to i32
    %c0_i32_6 = arith.constant 0 : i32
    %12 = arith.cmpi ne, %11, %c0_i32_6 : i32
    scf.if %12 {
      %cst_15 = arith.constant 0.000000e+00 : f32
      %19 = vector.broadcast %cst_15 : f32 to vector<1x8xf32>
      %c0_16 = arith.constant 0 : index
      %c0_17 = arith.constant 0 : index
      %20 = vector.load %arg2[%c0_16, %c0_17] : memref<1x8xf32, #tpu.memory_space<vmem>>, vector<1x8xf32>
      tpu.vector_store %arg2[%c0_16, %c0_17], %19 {strides = array<i32>} : memref<1x8xf32, #tpu.memory_space<vmem>>, vector<1x8xf32>,
      %cst_18 = arith.constant 0.000000e+00 : f32
      %21 = vector.broadcast %cst_18 : f32 to vector<1x8xf32>
      %c0_19 = arith.constant 0 : index
      %c0_20 = arith.constant 0 : index
      %22 = vector.load %arg3[%c0_19, %c0_20] : memref<1x8xf32, #tpu.memory_space<vmem>>, vector<1x8xf32>
      tpu.vector_store %arg3[%c0_19, %c0_20], %21 {strides = array<i32>} : memref<1x8xf32, #tpu.memory_space<vmem>>, vector<1x8xf32>,
    } else {
    }
    %c0_7 = arith.constant 0 : index
    %c0_8 = arith.constant 0 : index
    %13 = vector.load %arg2[%c0_7, %c0_8] : memref<1x8xf32, #tpu.memory_space<vmem>>, vector<1x8xf32>
    %14 = arith.addf %13, %5 : vector<1x8xf32>
    %c0_9 = arith.constant 0 : index
    %c0_10 = arith.constant 0 : index
    %15 = vector.load %arg2[%c0_9, %c0_10] : memref<1x8xf32, #tpu.memory_space<vmem>>, vector<1x8xf32>
    tpu.vector_store %arg2[%c0_9, %c0_10], %14 {strides = array<i32>} : memref<1x8xf32, #tpu.memory_space<vmem>>, vector<1x8xf32>,
    %c0_11 = arith.constant 0 : index
    %c0_12 = arith.constant 0 : index
    %16 = vector.load %arg3[%c0_11, %c0_12] : memref<1x8xf32, #tpu.memory_space<vmem>>, vector<1x8xf32>
    %17 = arith.addf %16, %9 : vector<1x8xf32>
    %c0_13 = arith.constant 0 : index
    %c0_14 = arith.constant 0 : index
    %18 = vector.load %arg3[%c0_13, %c0_14] : memref<1x8xf32, #tpu.memory_space<vmem>>, vector<1x8xf32>
    tpu.vector_store %arg3[%c0_13, %c0_14], %17 {strides = array<i32>} : memref<1x8xf32, #tpu.memory_space<vmem>>, vector<1x8xf32>,
    return
  }
  func.func @transform_0(%arg0: i32) -> (i32, i32, i32, i32) {
    %c0_i32 = arith.constant 0 : i32
    %c0_i32_0 = arith.constant 0 : i32
    %c0_i32_1 = arith.constant 0 : i32
    %c0_i32_2 = arith.constant 0 : i32
    return %arg0, %c0_i32, %c0_i32_0, %c0_i32_1 : i32, i32, i32, i32
  }
  func.func @transform_1(%arg0: i32) -> (i32, i32) {
    %c0_i32 = arith.constant 0 : i32
    %c0_i32_0 = arith.constant 0 : i32
    %c0_i32_1 = arith.constant 0 : i32
    return %c0_i32, %c0_i32_0 : i32, i32
  }
  func.func @transform_2(%arg0: i32) -> (i32, i32) {
    %c0_i32 = arith.constant 0 : i32
    %c0_i32_0 = arith.constant 0 : i32
    %c0_i32_1 = arith.constant 0 : i32
    return %c0_i32, %c0_i32_0 : i32, i32
  }
}

</mosaic_0001>

<bundles_post_ra>
// kernel: tpu_custom_call.1
= control target key start
LH: loop header
LB: loop body
LE: loop exit
PB: predicated region body
PF: predicated region fallthrough
CT: control target
= control target key end

     0   :  { %8 = vsyncpa [#allocation3], 0  ;;  %s606_s0 = inlined_call_operand.vmem [shape: bf16[2,16,8,8], index: 0, kind: input, shape index: {}]   ;;  %s607_s1 = inlined_call_operand.hbm [shape: f32[1,8], index: 1, kind: output, shape index: {0}]   ;;  %s608_s2 = inlined_call_operand.hbm [shape: f32[1,8], index: 2, kind: output, shape index: {1}]  }
   0x1   :  { %9 = vsyncpa [#allocation5], 0  ;;  %s498_s9 = smov 0  }
   0x2 LB: > { %s504_s10 = sadd.s32 4294967295, %s478_s9   ;;  %p339_p0 = scmp.ge.s32.totalorder %s478_s9, 1  ;;  %s478_s9 = sphi %s498_s9, %s15_s9  }
   0x3   : > { %p107_p1 = scmp.lt.s32.totalorder %s478_s9, 3 }
   0x5   : > { %p108_p2 = pnand %p339_p0, %p107_p1 }
   0x6   : > { %p124_p3 = scmp.lt.s32.totalorder (!%p108_p2), %s504_s10, 1  ;;  %vm161_vm0 = vcmask (!%p108_p2), 64512   ;;  %p342_p4 = scmp.ne.s32.totalorder (!%p108_p2), %s504_s10, 0 }
   0x7   : > { %111 = sbr.rel (%p108_p2) target bundleno = 116 (0x74), region = 24 }
   0xe   : > { %s125_s11 = scalar_select %p124_p3, %s504_s10, 1 }
   0xf   : > { %vm258_vm1 = vcmask (!%p342_p4), 57344  }
  0x10   : > { %s349_s12 = sshll.u32 %s125_s11, 6 }
  0x11   : > { %s513_s15 = scalar_lea.vmem %s606_s0, %s349_s12 }
  0x12   : > { %v351_v0 = vld [vmem:[%s513_s15] sm:$0xff]   ;;  %v382_v1 = vld [vmem:[%s513_s15 + $0x8] sm:$0xff]   ;;  %v383_v5 = vld [vmem:[%s513_s15 + $0x10] sm:$0xff]  }
  0x13   : > { %v352_v2 = vunpack.c.l.bf16 %v351_v0  ;;  %v353_v3 = vunpack.c.h.bf16 %v351_v0  ;;  %v356_v4 = vunpack.c.l.bf16 %v382_v1  ;;  %v357_v6 = vunpack.c.h.bf16 %v382_v1  ;;  %v384_v13 = vld [vmem:[%s513_s15 + $0x18] sm:$0xff]   ;;  %v385_v23 = vld [vmem:[%s513_s15 + $0x20] sm:$0xff]   ;;  %v386_v36 = vld [vmem:[%s513_s15 + $0x28] sm:$0xff]  }
  0x14   : > { %v360_v11 = vunpack.c.l.bf16 %v383_v5  ;;  %v361_v15 = vunpack.c.h.bf16 %v383_v5  ;;  %v364_v21 = vunpack.c.l.bf16 %v384_v13  ;;  %v365_v26 = vunpack.c.h.bf16 %v384_v13  ;;  %v387_v49 = vld [vmem:[%s513_s15 + $0x30] sm:$0xff]   ;;  %v388_v62 = vld [vmem:[%s513_s15 + $0x38] sm:$0xff]  }
  0x15   : > { %v162_v7 = vsel %vm161_vm0, %v352_v2, 0.0  ;;  %v163_v8 = vsel %vm161_vm0, %v353_v3, 0.0  ;;  %v165_v9 = vsel %vm161_vm0, %v356_v4, 0.0  ;;  %v167_v12 = vsel %vm161_vm0, %v357_v6, 0.0 }
  0x16   : > { %v164_v10 = vadd.f32 %v163_v8, %v162_v7  ;;  %v169_v16 = vsel %vm161_vm0, %v360_v11, 0.0  ;;  %v200_v18 = vmul.f32 %v352_v2, %v352_v2  ;;  %v201_v19 = vmul.f32 %v353_v3, %v353_v3 }
  0x17   : > { %v202_v20 = vmul.f32 %v356_v4, %v356_v4  ;;  %v171_v22 = vsel %vm161_vm0, %v361_v15, 0.0  ;;  %v203_v25 = vmul.f32 %v357_v6, %v357_v6  ;;  %v173_v27 = vsel %vm161_vm0, %v364_v21, 0.0 }
  0x18   : > { %v166_v14 = vadd.f32 %v165_v9, %v164_v10  ;;  %v204_v28 = vmul.f32 %v360_v11, %v360_v11  ;;  %v216_v30 = vsel %vm161_vm0, %v200_v18, 0.0  ;;  %v217_v31 = vsel %vm161_vm0, %v201_v19, 0.0 }
  0x19   : > { %v219_v32 = vsel %vm161_vm0, %v202_v20, 0.0  ;;  %v368_v33 = vunpack.c.l.bf16 %v385_v23  ;;  %v175_v34 = vsel %vm161_vm0, %v365_v26, 0.0  ;;  %v218_v35 = vadd.f32 %v217_v31, %v216_v30 }
  0x1a   : > { %v168_v17 = vadd.f32 %v167_v12, %v166_v14  ;;  %v205_v38 = vmul.f32 %v361_v15, %v361_v15  ;;  %v221_v39 = vsel %vm161_vm0, %v203_v25, 0.0  ;;  %v369_v40 = vunpack.c.h.bf16 %v385_v23 }
  0x1b   : > { %v177_v41 = vsel %vm161_vm0, %v368_v33, 0.0  ;;  %v220_v42 = vadd.f32 %v219_v32, %v218_v35  ;;  %v206_v44 = vmul.f32 %v364_v21, %v364_v21  ;;  %v223_v45 = vsel %vm161_vm0, %v204_v28, 0.0 }
  0x1c   : > { %v170_v24 = vadd.f32 %v169_v16, %v168_v17  ;;  %v372_v46 = vunpack.c.l.bf16 %v386_v36  ;;  %v179_v47 = vsel %vm161_vm0, %v369_v40, 0.0  ;;  %v207_v51 = vmul.f32 %v365_v26, %v365_v26 }
  0x1d   : > { %v222_v48 = vadd.f32 %v221_v39, %v220_v42  ;;  %v225_v52 = vsel %vm161_vm0, %v205_v38, 0.0  ;;  %v373_v53 = vunpack.c.h.bf16 %v386_v36  ;;  %v208_v57 = vmul.f32 %v368_v33, %v368_v33 }
  0x1e   : > { %v172_v29 = vadd.f32 %v171_v22, %v170_v24  ;;  %v181_v54 = vsel %vm161_vm0, %v372_v46, 0.0  ;;  %v227_v58 = vsel %vm161_vm0, %v206_v44, 0.0  ;;  %v376_v59 = vunpack.c.l.bf16 %v387_v49 }
  0x1f   : > { %v224_v55 = vadd.f32 %v223_v45, %v222_v48  ;;  %v183_v60 = vsel %vm161_vm0, %v373_v53, 0.0  ;;  %v209_v0 = vmul.f32 %v369_v40, %v369_v40  ;;  %v229_v1 = vsel %vm161_vm0, %v207_v51, 0.0 }
  0x20   : > { %v174_v37 = vadd.f32 %v173_v27, %v172_v29  ;;  %v377_v2 = vunpack.c.h.bf16 %v387_v49  ;;  %v185_v3 = vsel %vm161_vm0, %v376_v59, 0.0  ;;  %v210_v6 = vmul.f32 %v372_v46, %v372_v46 }
  0x21   : > { %v226_v61 = vadd.f32 %v225_v52, %v224_v55  ;;  %v231_v7 = vsel %vm161_vm0, %v208_v57, 0.0  ;;  %v380_v8 = vunpack.c.l.bf16 %v388_v62  ;;  %v211_v12 = vmul.f32 %v373_v53, %v373_v53 }
  0x22   : > { %v176_v43 = vadd.f32 %v175_v34, %v174_v37  ;;  %v187_v9 = vsel %vm161_vm0, %v377_v2, 0.0  ;;  %v233_v13 = vsel %vm161_vm0, %v209_v0, 0.0  ;;  %v381_v14 = vunpack.c.h.bf16 %v388_v62 }
  0x23   : > { %v228_v4 = vadd.f32 %v227_v58, %v226_v61  ;;  %v189_v15 = vsel %vm161_vm0, %v380_v8, 0.0  ;;  %v212_v18 = vmul.f32 %v376_v59, %v376_v59  ;;  %v235_v19 = vsel %vm161_vm0, %v210_v6, 0.0 }
  0x24   : > { %v178_v50 = vadd.f32 %v177_v41, %v176_v43  ;;  %v191_v20 = vsel %vm161_vm0, %v381_v14, 0.0  ;;  %v213_v23 = vmul.f32 %v377_v2, %v377_v2  ;;  %v237_v24 = vsel %vm161_vm0, %v211_v12, 0.0 }
  0x25   : > { %v230_v10 = vadd.f32 %v229_v1, %v228_v4  ;;  %v214_v27 = vmul.f32 %v380_v8, %v380_v8  ;;  %v239_v28 = vsel %vm161_vm0, %v212_v18, 0.0  ;;  %v215_v31 = vmul.f32 %v381_v14, %v381_v14 }
  0x26   : > { %v180_v56 = vadd.f32 %v179_v47, %v178_v50  ;;  %v241_v32 = vsel %vm161_vm0, %v213_v23, 0.0  ;;  %v480_v52 = vmov (!%p342_p4), 0.0  }
  0x27   : > { %v232_v16 = vadd.f32 %v231_v7, %v230_v10  ;;  %v243_v35 = vsel %vm161_vm0, %v214_v27, 0.0  ;;  %v245_v38 = vsel %vm161_vm0, %v215_v31, 0.0  ;;  %259 = vst.msk [vmem:[#allocation2] sm:$0x1] (!%p342_p4), %vm258_vm1, %v480_v52  ;;  %260 = vst.msk [vmem:[#allocation4] sm:$0x1] (!%p342_p4), %vm258_vm1, %v480_v52 }
  0x28   : > { %v182_v63 = vadd.f32 %v181_v54, %v180_v56 }
  0x29   : > { %v234_v21 = vadd.f32 %v233_v13, %v232_v16 }
  0x2a   : > { %v184_v5 = vadd.f32 %v183_v60, %v182_v63 }
  0x2b   : > { %v236_v25 = vadd.f32 %v235_v19, %v234_v21 }
  0x2c   : > { %v186_v11 = vadd.f32 %v185_v3, %v184_v5 }
  0x2d   : > { %v238_v29 = vadd.f32 %v237_v24, %v236_v25 }
  0x2e   : > { %v188_v17 = vadd.f32 %v187_v9, %v186_v11 }
  0x2f   : > { %v240_v34 = vadd.f32 %v239_v28, %v238_v29 }
  0x30   : > { %v190_v22 = vadd.f32 %v189_v15, %v188_v17 }
  0x31   : > { %v242_v37 = vadd.f32 %v241_v32, %v240_v34 }
  0x32   : > { %v192_v26 = vadd.f32 %v191_v20, %v190_v22 }
  0x33   : > { %v244_v40 = vadd.f32 %v243_v35, %v242_v37 }
  0x34   : > { %v193_v30 = vsel %vm161_vm0, %v192_v26, 0.0 }
  0x35   : > { %v194_v33 = vrot.slane %v193_v30, 4  ;;  %v246_v42 = vadd.f32 %v245_v38, %v244_v40 }
  0x37   : > { %v195_v36 = vadd.f32 %v194_v33, %v193_v30  ;;  %v247_v44 = vsel %vm161_vm0, %v246_v42, 0.0 }
  0x38   : > { %v248_v45 = vrot.slane %v247_v44, 4 }
  0x39   : > { %v196_v39 = vrot.slane %v195_v36, 2 }
  0x3a   : > { %v249_v47 = vadd.f32 %v248_v45, %v247_v44 }
  0x3b   : > { %v197_v41 = vadd.f32 %v196_v39, %v195_v36 }
  0x3c   : > { %v250_v48 = vrot.slane %v249_v47, 2  ;;  %257 = sbr.rel (%p342_p4) target bundleno = 67 (0x43), region = 28 }
  0x3d   : > { %v198_v43 = vrot.slane %v197_v41, 1 }
  0x3e   : > { %v251_v49 = vadd.f32 %v250_v48, %v249_v47 }
  0x3f   : > { %v199_v46 = vadd.f32 %v198_v43, %v197_v41 }
  0x40   : > { %v252_v50 = vrot.slane %v251_v49, 1 }
  0x42   : > { %v253_v51 = vadd.f32 %v252_v50, %v251_v49 }
  0x43 PF: > { %v261_v53 = vld [vmem:[#allocation2] sm:$0x1]  ;;  %vm263_vm2 = vcmask 57344   ;;  %v265_v54 = vld [vmem:[#allocation4] sm:$0x1]  ;;  %p397_p5 = scmp.eq.s32.totalorder %s504_s10, 1 }
  0x44   : > { %v262_v55 = vadd.f32 %v261_v53, %v199_v46  ;;  %v266_v56 = vadd.f32 %v265_v54, %v253_v51  ;;  %s481_s16 = smov [#allocation2]   ;;  %s482_s18 = smov [#allocation4]  }
  0x45   : > { %s275_s17 = sshll.u32 %s481_s16, 4  ;;  %s286_s19 = sshll.u32 %s482_s18, 4  ;;  %s276_s17 = int_to_ptr.vmem [resolvable:$true] %s275_s17  ;;  %s287_s19 = int_to_ptr.vmem [resolvable:$true] %s286_s19 }
  0x46   : > { %264 = vst.msk [vmem:[#allocation2] sm:$0x1] %vm263_vm2, %v262_v55  ;;  %267 = vst.msk [vmem:[#allocation4] sm:$0x1] %vm263_vm2, %v266_v56  ;;  %s412_s20 = scalar_lea.vmem %s276_s17, 16  ;;  %s418_s21 = scalar_lea.vmem %s276_s17, 32 }
  0x47   : > { %p413_p6 = scmp.ne.s32.totalorder %s276_s17, %s412_s20  ;;  %p419_p9 = scmp.lt.s32.totalorder %s276_s17, %s276_s17 }
  0x48   : > { %p420_p10 = scmp.lt.s32.totalorder %s418_s21, %s412_s20 }
  0x49   : > { %p414_p7 = pnand %p413_p6, %p397_p5 }
  0x4a   : > { %p421_p11 = por %p420_p10, %p419_p9 }
  0x4b   : > { %p415_p8 = pneg %p414_p7 }
  0x4d   : > { %p422_p12 = pnand %p421_p11, %p415_p8 }
  0x4f   : > { %425 = shalt.err (!%p422_p12)
}
  0x50   : > { %s426_s24 = scalar_lea.hbm %s607_s1, 16 }
  0x51   : > { %p427_p13 = scmp.ne.s32.totalorder %s607_s1, %s426_s24  ;;  %p432_p2 = scmp.lt.u32.totalorder %s426_s24, %s607_s1 }
  0x53   : > { %p428_p0 = pnand %p427_p13, %p397_p5 }
  0x55   : > { %p429_p1 = pneg %p428_p0 }
  0x57   : > { %p434_p3 = pnand %p432_p2, %p429_p1 }
  0x59   : > { %437 = shalt.err (!%p434_p3)
}
  0x5a   : > { %390 = dma.vmem_to_hbm [thread:$0]  (%p397_p5), %s276_s17, 16, %s607_s1, [#allocation3]  }
  0x5b   : > { %s438_s3 = scalar_lea.vmem %s287_s19, 16  ;;  %s444_s4 = scalar_lea.vmem %s287_s19, 32 }
  0x5c   : > { %p439_p4 = scmp.ne.s32.totalorder %s287_s19, %s438_s3  ;;  %p445_p8 = scmp.lt.s32.totalorder %s287_s19, %s287_s19 }
  0x5d   : > { %p446_p9 = scmp.lt.s32.totalorder %s444_s4, %s438_s3 }
  0x5e   : > { %p440_p6 = pnand %p439_p4, %p397_p5 }
  0x5f   : > { %p447_p10 = por %p446_p9, %p445_p8 }
  0x60   : > { %p441_p7 = pneg %p440_p6 }
  0x62   : > { %p448_p11 = pnand %p447_p10, %p441_p7 }
  0x64   : > { %451 = shalt.err (!%p448_p11)
}
  0x65   : > { %s452_s7 = scalar_lea.hbm %s608_s2, 16 }
  0x66   : > { %p453_p12 = scmp.ne.s32.totalorder %s608_s2, %s452_s7  ;;  %p458_p1 = scmp.lt.u32.totalorder %s452_s7, %s608_s2 }
  0x68   : > { %p454_p13 = pnand %p453_p12, %p397_p5 }
  0x6a   : > { %p455_p0 = pneg %p454_p13 }
  0x6c   : > { %p460_p2 = pnand %p458_p1, %p455_p0 }
  0x6e   : > { %463 = shalt.err (!%p460_p2)
}
  0x6f   : > { %392 = dma.vmem_to_hbm [thread:$0]  (%p397_p5), %s287_s19, 16, %s608_s2, [#allocation5]  }
  0x70   : > { %469 = dma.done.wait (%p397_p5), [#allocation3], 16  }
  0x71   : > { %471 = vsyncadd (%p397_p5), [#allocation3], 4294967280 }
  0x72   : > { %473 = dma.done.wait (%p397_p5), [#allocation5], 16  }
  0x73   : > { %475 = vsyncadd (%p397_p5), [#allocation5], 4294967280 }
  0x74 PF: > { %s15_s9 = sadd.s32 1, %s478_s9  }
  0x75   : > { %p12_p3 = scmp.ge.s32.totalorder %s15_s9, 4  }
  0x77   :  { %14 = sbr.rel (!%p12_p3) target bundleno = 2 (0x2), region = 63 }
  0x7e   :  { %303 = vsyncpa [#allocation3], 1 }
  0x7f   :  { %305 = vsyncpa [#allocation3 + $0x1], 1 }
  0x80   :  { %306 = vsyncpa [#allocation5], 1 }

</bundles_post_ra>
